<compile_context>
chip_gen: v5e
topology: v5e:2x2
jax: 0.10.0
libtpu: 0.0.40
codegen_flags: <defaults>
</compile_context>

<pallas_src>
import jax
import jax.numpy as jnp
from jax.experimental import pallas as pl
from jax.experimental.pallas import tpu as pltpu


def _attention_kernel(x_ref, wu_ref, bu_ref, wc_ref, o_ref):
    # x_ref:  (Bblk, T, F)   block of batch elements
    # wu_ref: (F, F)         Wu^T (so we compute x @ Wu^T)
    # bu_ref: (1, F)         bias row
    # wc_ref: (1, F)         context vector as a row
    # o_ref:  (Bblk, F)
    bblk, t, f = x_ref.shape
    x = x_ref[...].astype(jnp.float32)                         # (Bblk, T, F)

    # ---- u = tanh(X @ Wu^T + b) as one fat GEMM over (Bblk*T, F) ----------
    x2d = x.reshape(bblk * t, f)                               # free collapse (T % 8 == 0)
    u = jnp.tanh(
        jnp.dot(x2d, wu_ref[...], preferred_element_type=jnp.float32)
        + bu_ref[...]
    )                                                          # (Bblk*T, F)

    # ---- scores: VPU mul + lane reduce instead of an N=1 matmul ----------
    u3 = u.reshape(bblk, t, f)
    score = jnp.sum(u3 * wc_ref[...], axis=-1)                 # (Bblk, T)

    # ---- softmax over T (per batch element) -------------------------------
    score = score - jnp.max(score, axis=1, keepdims=True)
    e = jnp.exp(score)
    denom = jnp.sum(e, axis=1, keepdims=True)
    alpha = e * pl.reciprocal(denom, approx=True)              # (Bblk, T)

    # ---- weighted sum over T ----------------------------------------------
    out = jnp.sum(x * alpha[:, :, None], axis=1)               # (Bblk, F)
    o_ref[...] = out.astype(o_ref.dtype)


def _pick_block_b(B, T, F, itemsize, vmem_budget=8 * 1024 * 1024):
    """Largest batch tile whose double-buffered x block fits a VMEM budget."""
    max_b = max(1, vmem_budget // (2 * T * F * itemsize))
    if B <= max_b:
        return B
    # Need a proper tile: prefer a multiple-of-8 divisor of B (dense output rows).
    for cand in range(min(max_b, B - 1), 7, -1):
        if B % cand == 0 and cand % 8 == 0:
            return cand
    return B  # fallback: whole batch (compiler will complain if it truly OOMs)


def attention_layer(x, wu_t, bu, wc_row, block_b=None):
    """x: (B, T, 2H); wu_t: (2H, 2H) = Wu^T; bu: (2H,); wc_row: (1, 2H) -> (B, 2H)."""
    B, T, F = x.shape
    if block_b is None:
        block_b = _pick_block_b(B, T, F, x.dtype.itemsize)
    assert B % block_b == 0, "batch must divide evenly into batch tiles"

    bu2d = bu.reshape(1, F)

    return pl.pallas_call(
        _attention_kernel,
        out_shape=jax.ShapeDtypeStruct((B, F), x.dtype),
        grid_spec=pltpu.PrefetchScalarGridSpec(
            num_scalar_prefetch=0,
            grid=(pl.cdiv(B, block_b),),
            in_specs=[
                pl.BlockSpec((block_b, T, F), lambda b: (b, 0, 0)),  # x batch tile
                pl.BlockSpec((F, F), lambda b: (0, 0)),              # Wu^T (whole)
                pl.BlockSpec((1, F), lambda b: (0, 0)),              # bias row
                pl.BlockSpec((1, F), lambda b: (0, 0)),              # context row
            ],
            out_specs=pl.BlockSpec((block_b, F), lambda b: (b, 0)),
        ),
        compiler_params=pltpu.CompilerParams(
            dimension_semantics=("parallel",),
            vmem_limit_bytes=64 << 20,
        ),
    )(x, wu_t, bu2d, wc_row)


def reference(x, wu_t, bu, wc_row):
    # Pure-JAX reference mirroring the PyTorch forward.
    B, T, F = x.shape
    x1 = x.reshape(-1, F)
    u = jnp.tanh(x1 @ wu_t + bu)
    alpha = (u @ wc_row.T).reshape(B, T)
    alpha = jax.nn.softmax(alpha, axis=1)
    return jnp.sum(alpha[:, :, None] * x, axis=1)


if __name__ == "__main__":
    hidden_size = 16           # => feature dim 2H = 32
    B, T, F = 2, 8, hidden_size * 2

    key = jax.random.PRNGKey(0)
    kx, kw, kb, kc = jax.random.split(key, 4)

    x = jax.random.normal(kx, (B, T, F), dtype=jnp.float32)

    # Deterministic synthetic parameters matching nn.Linear shapes:
    #   u:         weight (2H, 2H), bias (2H,)
    #   u_context: weight (1, 2H), no bias
    bound = 1.0 / jnp.sqrt(F)
    wu = jax.random.uniform(kw, (F, F), minval=-bound, maxval=bound, dtype=jnp.float32)
    bu = jax.random.uniform(kb, (F,), minval=-bound, maxval=bound, dtype=jnp.float32)
    wc_row = jax.random.uniform(kc, (1, F), minval=-bound, maxval=bound, dtype=jnp.float32)

    wu_t = wu.T                 # kernel computes x @ Wu^T

    out = attention_layer(x, wu_t, bu, wc_row)
    out = jax.block_until_ready(out)

    ref = reference(x, wu_t, bu, wc_row)
    assert out.shape == (B, F)
    # approx=True reciprocal in the softmax -> allow ~1e-3-level differences.
    assert jnp.allclose(out, ref, atol=2e-3, rtol=2e-3), "mismatch vs reference"

    print("KERNEL_OK")
</pallas_src>

<mosaic_0001>
module attributes {stable_mosaic.version = 11 : i64} {
  func.func @_attention_kernel(%arg0: i32, %arg1: memref<2x8x32xf32, #tpu.memory_space<vmem>>, %arg2: memref<32x32xf32, #tpu.memory_space<vmem>>, %arg3: memref<1x32xf32, #tpu.memory_space<vmem>>, %arg4: memref<1x32xf32, #tpu.memory_space<vmem>>, %arg5: memref<2x32xf32, #tpu.memory_space<vmem>>) attributes {dimension_semantics = [#tpu.dimension_semantics<parallel>], iteration_bounds = array<i64: 1>, scalar_prefetch = 0 : i64, scratch_operands = 0 : i64, tpu.core_type = #tpu.core_type<tc>, window_params = [{transform_indices = @transform_0, window_bounds = array<i64: 2, 8, 32>}, {pipeline_mode = #tpu.pipeline_mode<synchronous>, transform_indices = @transform_1, window_bounds = array<i64: 32, 32>}, {pipeline_mode = #tpu.pipeline_mode<synchronous>, transform_indices = @transform_2, window_bounds = array<i64: 1, 32>}, {pipeline_mode = #tpu.pipeline_mode<synchronous>, transform_indices = @transform_3, window_bounds = array<i64: 1, 32>}, {transform_indices = @transform_4, window_bounds = array<i64: 2, 32>}]} {
    %c0 = arith.constant 0 : index
    %c0_0 = arith.constant 0 : index
    %c0_1 = arith.constant 0 : index
    %0 = vector.load %arg1[%c0, %c0_0, %c0_1] : memref<2x8x32xf32, #tpu.memory_space<vmem>>, vector<2x8x32xf32>
    %1 = vector.shape_cast %0 : vector<2x8x32xf32> to vector<16x32xf32>
    %c0_2 = arith.constant 0 : index
    %c0_3 = arith.constant 0 : index
    %2 = vector.load %arg2[%c0_2, %c0_3] : memref<32x32xf32, #tpu.memory_space<vmem>>, vector<32x32xf32>
    %cst = arith.constant dense<0.000000e+00> : vector<16x32xf32>
    %3 = tpu.matmul %1, %2, %cst {dimension_numbers = #tpu.dot_dimension_numbers<[1], [0], [0], [1], [0, 0, 1, 1], [], []>} : vector<16x32xf32>, vector<32x32xf32>, vector<16x32xf32> -> vector<16x32xf32>
    %c0_4 = arith.constant 0 : index
    %c0_5 = arith.constant 0 : index
    %4 = vector.load %arg3[%c0_4, %c0_5] : memref<1x32xf32, #tpu.memory_space<vmem>>, vector<1x32xf32>
    %5 = vector.broadcast %4 : vector<1x32xf32> to vector<16x32xf32>
    %6 = arith.addf %3, %5 : vector<16x32xf32>
    %7 = math.tanh %6 : vector<16x32xf32>
    %8 = vector.shape_cast %7 : vector<16x32xf32> to vector<2x8x32xf32>
    %c0_6 = arith.constant 0 : index
    %c0_7 = arith.constant 0 : index
    %9 = vector.load %arg4[%c0_6, %c0_7] : memref<1x32xf32, #tpu.memory_space<vmem>>, vector<1x32xf32>
    %10 = vector.shape_cast %9 : vector<1x32xf32> to vector<1x1x32xf32>
    %11 = vector.broadcast %10 : vector<1x1x32xf32> to vector<2x8x32xf32>
    %12 = arith.mulf %8, %11 : vector<2x8x32xf32>
    %cst_8 = arith.constant dense<0.000000e+00> : vector<2x8xf32>
    %13 = vector.multi_reduction <add>, %12, %cst_8 [2] : vector<2x8x32xf32> to vector<2x8xf32>
    %cst_9 = arith.constant dense<0xFF800000> : vector<2xf32>
    %14 = vector.multi_reduction <maximumf>, %13, %cst_9 [1] : vector<2x8xf32> to vector<2xf32>
    %15 = vector.shape_cast %14 : vector<2xf32> to vector<2x1xf32>
    %16 = vector.broadcast %15 : vector<2x1xf32> to vector<2x8xf32>
    %17 = arith.subf %13, %16 : vector<2x8xf32>
    %18 = math.exp %17 : vector<2x8xf32>
    %cst_10 = arith.constant dense<0.000000e+00> : vector<2xf32>
    %19 = vector.multi_reduction <add>, %18, %cst_10 [1] : vector<2x8xf32> to vector<2xf32>
    %20 = vector.shape_cast %19 : vector<2xf32> to vector<2x1xf32>
    %21 = tpu.reciprocal %20 {approx = true} : vector<2x1xf32> -> vector<2x1xf32>
    %22 = vector.broadcast %21 : vector<2x1xf32> to vector<2x8xf32>
    %23 = arith.mulf %18, %22 : vector<2x8xf32>
    %24 = vector.shape_cast %23 : vector<2x8xf32> to vector<2x8x1xf32>
    %25 = vector.broadcast %24 : vector<2x8x1xf32> to vector<2x8x32xf32>
    %26 = arith.mulf %0, %25 : vector<2x8x32xf32>
    %cst_11 = arith.constant dense<0.000000e+00> : vector<2x32xf32>
    %27 = vector.multi_reduction <add>, %26, %cst_11 [1] : vector<2x8x32xf32> to vector<2x32xf32>
    %c0_12 = arith.constant 0 : index
    %c0_13 = arith.constant 0 : index
    %28 = vector.load %arg5[%c0_12, %c0_13] : memref<2x32xf32, #tpu.memory_space<vmem>>, vector<2x32xf32>
    tpu.vector_store %arg5[%c0_12, %c0_13], %27 {strides = array<i32>} : memref<2x32xf32, #tpu.memory_space<vmem>>, vector<2x32xf32>,
    return
  }
  func.func @transform_0(%arg0: i32) -> (i32, i32, i32) {
    %c0_i32 = arith.constant 0 : i32
    %c0_i32_0 = arith.constant 0 : i32
    %c0_i32_1 = arith.constant 0 : i32
    return %arg0, %c0_i32, %c0_i32_0 : i32, i32, i32
  }
  func.func @transform_1(%arg0: i32) -> (i32, i32) {
    %c0_i32 = arith.constant 0 : i32
    %c0_i32_0 = arith.constant 0 : i32
    %c0_i32_1 = arith.constant 0 : i32
    return %c0_i32, %c0_i32_0 : i32, i32
  }
  func.func @transform_2(%arg0: i32) -> (i32, i32) {
    %c0_i32 = arith.constant 0 : i32
    %c0_i32_0 = arith.constant 0 : i32
    %c0_i32_1 = arith.constant 0 : i32
    return %c0_i32, %c0_i32_0 : i32, i32
  }
  func.func @transform_3(%arg0: i32) -> (i32, i32) {
    %c0_i32 = arith.constant 0 : i32
    %c0_i32_0 = arith.constant 0 : i32
    %c0_i32_1 = arith.constant 0 : i32
    return %c0_i32, %c0_i32_0 : i32, i32
  }
  func.func @transform_4(%arg0: i32) -> (i32, i32) {
    %c0_i32 = arith.constant 0 : i32
    %c0_i32_0 = arith.constant 0 : i32
    return %arg0, %c0_i32 : i32, i32
  }
}

</mosaic_0001>

<bundles_post_ra>
// kernel: tpu_custom_call.1
= control target key start
LH: loop header
LB: loop body
LE: loop exit
PB: predicated region body
PF: predicated region fallthrough
CT: control target
= control target key end

     0   :  { %9 = vsyncpa [#allocation3], 0  ;;  %s371_s0 = inlined_call_operand.hbm [shape: f32[2,8,32], index: 0, kind: input, shape index: {}]   ;;  %s372_s1 = inlined_call_operand.hbm [shape: f32[32,32], index: 1, kind: input, shape index: {}]   ;;  %s373_s2 = inlined_call_operand.vmem [shape: f32[1,32], index: 2, kind: input, shape index: {}]   ;;  %s374_s3 = inlined_call_operand.vmem [shape: f32[1,32], index: 3, kind: input, shape index: {}]   ;;  %s375_s4 = inlined_call_operand.hbm [shape: f32[2,32], index: 4, kind: output, shape index: {}]  }
   0x1   :  { %10 = vsyncpa [#allocation6], 0 }
   0x2   :  { %11 = vsyncpa [#allocation4], 0  ;;  %s16_s17 = sshll.u32 %s371_s0, 4  ;;  %s306_s18 = smov [#allocation2]   ;;  %s17_s17 = int_to_ptr.hbm [resolvable:$true] %s16_s17 }
   0x3   :  { %s18_s19 = sshll.u32 %s306_s18, 4  ;;  %s29_s22 = sshll.u32 %s372_s1, 4  ;;  %s19_s19 = int_to_ptr.vmem [resolvable:$true] %s18_s19  ;;  %s30_s22 = int_to_ptr.hbm [resolvable:$true] %s29_s22 }
   0x4   :  { %s307_s23 = smov 128   ;;  %s308_s24 = smov 8  }
   0x5   :  { %24 = dma.hbm_to_vmem [thread:$0]  %s17_s17, 256, %s19_s19, [#allocation3], %s307_s23, %s307_s23, %s308_s24  }
   0x6   :  { %s309_s25 = smov [#allocation5]  }
   0x7   :  { %s31_s26 = sshll.u32 %s309_s25, 4  ;;  %s32_s26 = int_to_ptr.vmem [resolvable:$true] %s31_s26 }
   0x8   :  { %37 = dma.hbm_to_vmem [thread:$0]  %s30_s22, 512, %s32_s26, [#allocation6], %s307_s23, %s307_s23, %s308_s24  }
   0x9   :  { %300 = dma.done.wait [#allocation3], 256  }
   0xa   :  { %301 = vsyncadd [#allocation3], 4294967040 }
   0xb   :  { %302 = dma.done.wait [#allocation6], 512  }
   0xc   :  { %303 = vsyncadd [#allocation6], 4294966784  ;;  %v55_v0 = vld [vmem:[#allocation5 + $0x18] sm:$0xff]  ;;  %v54_v1 = vld [vmem:[#allocation5 + $0x10] sm:$0xff]  ;;  %vm60_vm0 = vcmask 261120   ;;  %v106_v19 = vlaneseq  ;;  %vm110_vm1 = vcmask 1041409  }
   0xd   :  { %79 = vmatpush.msra.mxu0 %v55_v0  ;;  %203 = vmatpush.msra.mxu1 %v55_v0  ;;  %v53_v2 = vld [vmem:[#allocation5 + $0x8] sm:$0xff]  ;;  %v52_v3 = vld [vmem:[#allocation5] sm:$0xff]  ;;  %v343_v4 = vld [vmem:[#allocation2] sm:$0xff]  ;;  %vm113_vm2 = vcmask 58368   ;;  %v310_v26 = vmov 0   ;;  %s190_s5 = sshll.u32 %s375_s4, 4  ;;  %s191_s5 = int_to_ptr.hbm [resolvable:$true] %s190_s5 }
   0xe   :  { %v345_v5 = vld [vmem:[#allocation2 + $0x8] sm:$0xff]  ;;  %v216_v6 = vld [vmem:[%s373_s2] ss:$0 sm:$0xff]  ;;  %v107_v20 = vand.u32 127, %v106_v19  ;;  %214 = vset.pattern.permute.xlu2 %v310_v26  ;;  %213 = vset.pattern.permute.xlu1 %v310_v26  ;;  %s311_s2 = smov [#allocation7]   ;;  %vm181_vm3 = vcmask 254976  }
   0xf   :  { %80 = vmatpush.msra.mxu0 %v54_v1  ;;  %204 = vmatpush.msra.mxu1 %v54_v1  ;;  %v217_v11 = vld [vmem:[%s374_s3] ss:$0 sm:$0xff]  ;;  %s188_s3 = sshll.u32 %s311_s2, 4  ;;  %s189_s3 = int_to_ptr.vmem [resolvable:$true] %s188_s3 }
  0x10   :  { %215 = vset.pattern.permute.xlu0 %v310_v26 }
  0x11   :  { %81 = vmatpush.msra.mxu0 %v53_v2  ;;  %205 = vmatpush.msra.mxu1 %v53_v2 }
  0x13   :  { %82 = vmatpush.msra.mxu0 %v52_v3  ;;  %206 = vmatpush.msra.mxu1 %v52_v3 }
  0x14   :  { %201 = vmatmul.msk.f32.vlgmr.msra.gmra.mxu0 %vm60_vm0, %v343_v4  ;;  %202 = vmatmul.msk.f32.vlgmr.msra.gmra.mxu1 %vm60_vm0, %v345_v5 }
  0x91   :  { %v84_v7 = vpop.f32.mrf.mxu0  ;;  %v87_v8 = vpop.f32.mrf.mxu1 }
  0x92   :  { %v85_v9 = vadd.f32 %v216_v6, %v84_v7  ;;  %v88_v10 = vadd.f32 %v216_v6, %v87_v8 }
  0x94   :  { %218 = vtanh.f32 %v85_v9 }
  0x95   :  { %220 = vtanh.f32 %v88_v10 }
  0x9a   :  { %v219_v12 = vpop.eup %218 }
  0x9b   :  { %v96_v13 = vmul.f32 %v219_v12, %v217_v11  ;;  %v221_v14 = vpop.eup %220 }
  0x9c   :  { %v97_v16 = vmul.f32 %v221_v14, %v217_v11 }
  0x9d   :  { %v98_v15 = vsel %vm60_vm0, %v96_v13, 0.0 }
  0x9e   :  { %99 = vadd.xlane.f32.xlu0 %v98_v15  ;;  %v101_v17 = vsel %vm60_vm0, %v97_v16, 0.0 }
  0xa6   :  { %102 = vadd.xlane.f32.xlu0 %v101_v17 }
 0x111   :  { %v100_v18 = vpop.xlane.xlu0 %99 }
 0x112   :  { %v108_v22 = vperm.slane %v100_v18, %v107_v20 }
 0x119   :  { %v103_v21 = vpop.xlane.xlu0 %102 }
 0x11a   :  { %v109_v23 = vperm.slane %v103_v21, %v107_v20 }
 0x11c   :  { %v111_v24 = vsel %vm110_vm1, %v109_v23, %v108_v22 }
 0x11d   :  { %v114_v25 = vsel %vm113_vm2, %v111_v24, -inf }
 0x11e   :  { %115 = vmax.xlane.f32.xlu1 %v114_v25 }
 0x191   :  { %v116_v27 = vpop.xlane.xlu1 %115 }
 0x192   :  { %v118_v28 = vperm.slane %v116_v27, 0  ;;  %v119_v29 = vperm.slane %v116_v27, 1 }
 0x194   :  { %v122_v30 = vsub.f32 %v100_v18, %v118_v28  ;;  %v123_v31 = vsub.f32 %v103_v21, %v119_v29 }
 0x196   :  { %v124_v32 = vmul.f32 1.442695, %v122_v30  ;;  %v126_v33 = vmul.f32 1.442695, %v123_v31 }
 0x198   :  { %222 = vpow2.f32 %v124_v32 }
 0x199   :  { %224 = vpow2.f32 %v126_v33 }
 0x19e   :  { %v223_v34 = vpop.eup %222 }
 0x19f   :  { %v225_v35 = vpop.eup %224  ;;  %131 = vperm.xlu1 %213, %v223_v34  }
 0x1a0   :  { %134 = vperm.xlu2 %214, %v225_v35  }
 0x1fa   :  { %v135_v36 = vpop.permute.xlu2 %134 }
 0x1fb   :  { %v137_v38 = vperm.slane %v135_v36, %v107_v20 }
 0x211   :  { %v132_v37 = vpop.permute.xlu1 %131 }
 0x212   :  { %v136_v39 = vperm.slane %v132_v37, %v107_v20 }
 0x214   :  { %v138_v40 = vsel %vm110_vm1, %v137_v38, %v136_v39 }
 0x215   :  { %v140_v41 = vsel %vm113_vm2, %v138_v40, 0.0 }
 0x216   :  { %141 = vadd.xlane.f32.xlu2 %v140_v41 }
 0x289   :  { %v142_v42 = vpop.xlane.xlu2 %141 }
 0x28a   :  { %226 = vrcp.f32 %v142_v42 }
 0x290   :  { %v227_v43 = vpop.eup %226 }
 0x291   :  { %v146_v44 = vperm.slane %v227_v43, 1  ;;  %v145_v45 = vperm.slane %v227_v43, 0 }
 0x293   :  { %v150_v46 = vmul.f32 %v225_v35, %v146_v44  ;;  %v149_v47 = vmul.f32 %v223_v34, %v145_v45 }
 0x295   :  { %158 = vperm.xlu1 %213, %v150_v46   ;;  %153 = vperm.xlu0 %215, %v149_v47  }
 0x307   :  { %v159_v48 = vpop.permute.xlu1 %158  ;;  %v154_v49 = vpop.permute.xlu0 %153 }
 0x308   :  { %v162_v50 = vmul.f32 %v159_v48, %v345_v5  ;;  %v161_v51 = vmul.f32 %v154_v49, %v343_v4 }
 0x30a   :  { %v170_v52 = vsel %vm60_vm0, %v162_v50, 0.0  ;;  %v163_v53 = vsel %vm60_vm0, %v161_v51, 0.0 }
 0x30b   :  { %v171_v54 = vrot.slane %v170_v52, 4  ;;  %v164_v55 = vrot.slane %v163_v53, 4 }
 0x30d   :  { %v172_v56 = vadd.f32 %v171_v54, %v170_v52  ;;  %v165_v57 = vadd.f32 %v164_v55, %v163_v53 }
 0x30f   :  { %v173_v58 = vrot.slane %v172_v56, 2  ;;  %v166_v59 = vrot.slane %v165_v57, 2 }
 0x311   :  { %v174_v60 = vadd.f32 %v173_v58, %v172_v56  ;;  %v167_v61 = vadd.f32 %v166_v59, %v165_v57 }
 0x313   :  { %v175_v62 = vrot.slane %v174_v60, 1  ;;  %v168_v63 = vrot.slane %v167_v61, 1 }
 0x315   :  { %v176_v0 = vadd.f32 %v175_v62, %v174_v60  ;;  %v169_v1 = vadd.f32 %v168_v63, %v167_v61 }
 0x317   :  { %v179_v2 = vsel %vm110_vm1, %v176_v0, %v169_v1 }
 0x318   :  { %182 = vst.msk [vmem:[#allocation7] sm:$0x3] %vm181_vm3, %v179_v2 }
 0x319   :  { %193 = dma.vmem_to_hbm [thread:$0]  %s189_s3, 32, %s191_s5, [#allocation4]  }
 0x31a   :  { %304 = dma.done.wait [#allocation4], 32  }
 0x31b   :  { %305 = vsyncadd [#allocation4], 4294967264 }
 0x31c   :  { %198 = vsyncpa [#allocation3], 1 }
 0x31d   :  { %199 = vsyncpa [#allocation6], 1 }
 0x31e   :  { %200 = vsyncpa [#allocation4], 1 }

</bundles_post_ra>
